<compile_context>
chip_gen: v5e
topology: v5e:2x2
jax: 0.10.0
libtpu: 0.0.40
codegen_flags: <defaults>
</compile_context>

<pallas_src>
import functools

import jax
import jax.numpy as jnp
from jax.experimental import pallas as pl
from jax.experimental.pallas import tpu as pltpu


def _squash_flat(s, e_exp, e_red):
    """squash() on the flattened layout.

    s:     (BB, F)  with F = OC*OD; capsule o occupies lanes [o*OD, (o+1)*OD)
    e_exp: (OC, F)  constant 0/1 expansion matrix (E[o, o*OD + d] = 1)
    e_red: (F, OC)  its transpose (reduces each OD-lane group)
    """
    l2 = jax.lax.dot_general(s * s, e_red, (((1,), (0,)), ((), ())),
                             preferred_element_type=jnp.float32)      # (BB, OC)
    # scale = l2 / (1 + l2) / sqrt(l2) == sqrt(l2) / (1 + l2); rsqrt -> EUP.
    scale = l2 * jax.lax.rsqrt(l2) / (1.0 + l2)                       # (BB, OC)
    scale_wide = jax.lax.dot_general(scale, e_exp, (((1,), (0,)), ((), ())),
                                     preferred_element_type=jnp.float32)
    return s * scale_wide                                             # (BB, F)


def _routing_kernel(b_ref, c0w_ref, e_exp_ref, e_red_ref, u_ref, v_ref,
                    *, n_iterations, oc):
    # b_ref    : (IC, OC)     routing-logit parameter (shared across batch)
    # c0w_ref  : (IC, F)      softmax(b) pre-expanded over the OD lanes (hoisted)
    # e_exp_ref: (OC, F)      constant 0/1 expansion matrix
    # e_red_ref: (F, OC)      constant 0/1 reduction matrix (= e_exp.T)
    # u_ref    : (BB, IC, F)  predictions, lane-dense last dim F = OC*OD
    # v_ref    : (BB, F)      output capsules, lane-dense
    u = u_ref[...]                      # native dtype; promoted per-op below
    bb, ic, f = u.shape
    e_exp = e_exp_ref[...]
    e_red = e_red_ref[...]

    # Iteration 0: batch-independent coupling coefficients (hoisted softmax).
    c_wide = c0w_ref[...]                                   # (IC, F) f32
    # IC is a leading (non-minor) axis -> plain VALU accumulates across vregs.
    s = jnp.sum(c_wide[None, :, :] * u, axis=1)             # (BB, F) f32
    v = _squash_flat(s, e_exp, e_red)

    b_batch = b_ref[...].astype(jnp.float32)[None, :, :]    # (1, IC, OC)
    # n_iterations is a small static int -> full unroll is fine.
    # TODO(synk): switch to lax.fori_loop carrying (b_batch, v) if n grows large.
    for _ in range(n_iterations):
        # agreement: a[b,i,o] = sum_d u[b,i,o,d] * v[b,o,d]
        # expressed as a 128-wide lane contraction against the 0/1 matrix e_red
        # (MXU), keeping the big tensor lane-dense.
        t = u * v[:, None, :]                               # (BB, IC, F) f32
        a = jax.lax.dot_general(
            t.reshape(bb * ic, f), e_red, (((1,), (0,)), ((), ())),
            preferred_element_type=jnp.float32).reshape(bb, ic, oc)
        b_batch = b_batch + a                               # (BB, IC, OC)

        # softmax over output capsules (small tensor).
        m = jnp.max(b_batch, axis=-1, keepdims=True)
        e = jnp.exp(b_batch - m)
        c = e * (1.0 / jnp.sum(e, axis=-1, keepdims=True))  # (BB, IC, OC)

        # Expand c back to the lane-dense layout, then reduce over input caps.
        c_wide = jax.lax.dot_general(
            c.reshape(bb * ic, oc), e_exp, (((1,), (0,)), ((), ())),
            preferred_element_type=jnp.float32).reshape(bb, ic, f)
        s = jnp.sum(c_wide * u, axis=1)                     # (BB, F)
        v = _squash_flat(s, e_exp, e_red)

    v_ref[...] = v.astype(v_ref.dtype)


def _pick_block_batch(batch, ic, f, itemsize):
    """Batch rows per grid step, sized against a conservative VMEM budget."""
    # Live per batch row: double-buffered input block + ~4 f32 temporaries of
    # the same (IC, F) footprint (t, c_wide, products, ...).
    per_row = ic * f * (2 * itemsize + 4 * 4)
    budget = 16 * 1024 * 1024   # fits v7x's 64 MiB VMEM with headroom;
                                # v5e/v6e (128 MiB) are automatically fine.
    bb = max(1, budget // per_row)
    if bb >= batch:
        return batch            # whole batch in one step (block == full dim)
    bb = max(8, (bb // 8) * 8)  # keep output blocks sublane-aligned
    # Keep >= 2 grid steps so both v7x TensorCores get work on the parallel axis.
    while bb >= 16 and pl.cdiv(batch, bb) < 2:
        bb -= 8
    return min(bb, batch)


def agreement_routing(b, u_predict, n_iterations):
    """Pallas implementation of AgreementRouting.forward.

    b:         (input_caps, output_caps) routing-logit parameter.
    u_predict: (batch, input_caps, output_caps, output_dim)
    returns    (batch, output_caps, output_dim)
    """
    B, IC, OC, OD = u_predict.shape
    assert b.shape == (IC, OC)
    F = OC * OD

    # Lane-dense layout (free XLA reshape outside the kernel).
    u_flat = u_predict.reshape(B, IC, F)

    # Hoisted, batch-independent iteration-0 coupling coefficients.
    c0 = jax.nn.softmax(b.astype(jnp.float32), axis=-1)          # (IC, OC)
    c0_wide = jnp.repeat(c0, OD, axis=-1)                        # (IC, F)

    # Constant 0/1 expansion / reduction matrices between (.., OC) and (.., F).
    group = jnp.arange(F, dtype=jnp.int32) // OD
    e_exp = (group[None, :] == jnp.arange(OC, dtype=jnp.int32)[:, None]
             ).astype(jnp.float32)                               # (OC, F)
    e_red = jnp.transpose(e_exp)                                 # (F, OC)

    bb = _pick_block_batch(B, IC, F, u_predict.dtype.itemsize)
    grid = (pl.cdiv(B, bb),)

    kernel = functools.partial(_routing_kernel,
                               n_iterations=n_iterations, oc=OC)
    v_flat = pl.pallas_call(
        kernel,
        out_shape=jax.ShapeDtypeStruct((B, F), u_predict.dtype),
        grid=grid,
        in_specs=[
            pl.BlockSpec((IC, OC), lambda i: (0, 0)),            # b
            pl.BlockSpec((IC, F), lambda i: (0, 0)),             # c0_wide
            pl.BlockSpec((OC, F), lambda i: (0, 0)),             # e_exp
            pl.BlockSpec((F, OC), lambda i: (0, 0)),             # e_red
            pl.BlockSpec((bb, IC, F), lambda i: (i, 0, 0)),      # u (batch tile)
        ],
        out_specs=pl.BlockSpec((bb, F), lambda i: (i, 0)),
        compiler_params=pltpu.CompilerParams(
            dimension_semantics=("parallel",),
            vmem_limit_bytes=32 * 1024 * 1024,
        ),
    )(b, c0_wide, e_exp, e_red, u_flat)

    return v_flat.reshape(B, OC, OD)


def agreement_routing_ref(b, u, n_iterations):
    """Pure-JAX reference mirroring the PyTorch forward exactly."""
    def squash(x):
        l2 = jnp.sum(x * x, axis=-1, keepdims=True)
        return x * (l2 / (1.0 + l2) / jnp.sqrt(l2))

    c = jax.nn.softmax(b, axis=-1)                               # (IC, OC)
    s = jnp.sum(c[None, :, :, None] * u, axis=1)                 # (B, OC, OD)
    v = squash(s)
    if n_iterations > 0:
        b_batch = jnp.broadcast_to(b, (u.shape[0],) + b.shape)
        for _ in range(n_iterations):
            b_batch = b_batch + jnp.sum(u * v[:, None, :, :], axis=-1)
            c = jax.nn.softmax(b_batch, axis=-1)[..., None]      # (B, IC, OC, 1)
            s = jnp.sum(c * u, axis=1)
            v = squash(s)
    return v


if __name__ == "__main__":
    # Small shapes consistent with the module's forward signature.
    batch = 2
    input_caps = 16
    output_caps = 8
    output_dim = 16
    n_iterations = 3

    key = jax.random.PRNGKey(0)
    u_predict = jax.random.normal(
        key, (batch, input_caps, output_caps, output_dim), dtype=jnp.float32)
    # Parameter init exactly as in __init__: b = zeros((input_caps, output_caps))
    b = jnp.zeros((input_caps, output_caps), dtype=jnp.float32)

    v = agreement_routing(b, u_predict, n_iterations)
    v = jax.block_until_ready(v)

    v_ref = agreement_routing_ref(b, u_predict, n_iterations)
    assert v.shape == (batch, output_caps, output_dim)
    assert jnp.allclose(v, v_ref, rtol=1e-4, atol=2e-5), (
        float(jnp.max(jnp.abs(v - v_ref))))

    print("KERNEL_OK")
</pallas_src>

<mosaic_0001>
module attributes {stable_mosaic.version = 11 : i64} {
  func.func @_routing_kernel(%arg0: i32, %arg1: memref<16x8xf32, #tpu.memory_space<vmem>>, %arg2: memref<16x128xf32, #tpu.memory_space<vmem>>, %arg3: memref<8x128xf32, #tpu.memory_space<vmem>>, %arg4: memref<128x8xf32, #tpu.memory_space<vmem>>, %arg5: memref<2x16x128xf32, #tpu.memory_space<vmem>>, %arg6: memref<2x128xf32, #tpu.memory_space<vmem>>) attributes {dimension_semantics = [#tpu.dimension_semantics<parallel>], iteration_bounds = array<i64: 1>, scalar_prefetch = 0 : i64, scratch_operands = 0 : i64, tpu.core_type = #tpu.core_type<tc>, window_params = [{pipeline_mode = #tpu.pipeline_mode<synchronous>, transform_indices = @transform_0, window_bounds = array<i64: 16, 8>}, {pipeline_mode = #tpu.pipeline_mode<synchronous>, transform_indices = @transform_1, window_bounds = array<i64: 16, 128>}, {pipeline_mode = #tpu.pipeline_mode<synchronous>, transform_indices = @transform_2, window_bounds = array<i64: 8, 128>}, {pipeline_mode = #tpu.pipeline_mode<synchronous>, transform_indices = @transform_3, window_bounds = array<i64: 128, 8>}, {transform_indices = @transform_4, window_bounds = array<i64: 2, 16, 128>}, {transform_indices = @transform_5, window_bounds = array<i64: 2, 128>}]} {
    %c0 = arith.constant 0 : index
    %c0_0 = arith.constant 0 : index
    %c0_1 = arith.constant 0 : index
    %0 = vector.load %arg5[%c0, %c0_0, %c0_1] : memref<2x16x128xf32, #tpu.memory_space<vmem>>, vector<2x16x128xf32>
    %c0_2 = arith.constant 0 : index
    %c0_3 = arith.constant 0 : index
    %1 = vector.load %arg3[%c0_2, %c0_3] : memref<8x128xf32, #tpu.memory_space<vmem>>, vector<8x128xf32>
    %c0_4 = arith.constant 0 : index
    %c0_5 = arith.constant 0 : index
    %2 = vector.load %arg4[%c0_4, %c0_5] : memref<128x8xf32, #tpu.memory_space<vmem>>, vector<128x8xf32>
    %c0_6 = arith.constant 0 : index
    %c0_7 = arith.constant 0 : index
    %3 = vector.load %arg2[%c0_6, %c0_7] : memref<16x128xf32, #tpu.memory_space<vmem>>, vector<16x128xf32>
    %4 = vector.shape_cast %3 : vector<16x128xf32> to vector<1x16x128xf32>
    %5 = vector.broadcast %4 : vector<1x16x128xf32> to vector<2x16x128xf32>
    %6 = arith.mulf %5, %0 : vector<2x16x128xf32>
    %cst = arith.constant dense<0.000000e+00> : vector<2x128xf32>
    %7 = vector.multi_reduction <add>, %6, %cst [1] : vector<2x16x128xf32> to vector<2x128xf32>
    %8 = arith.mulf %7, %7 : vector<2x128xf32>
    %cst_8 = arith.constant dense<0.000000e+00> : vector<2x8xf32>
    %9 = tpu.matmul %8, %2, %cst_8 {dimension_numbers = #tpu.dot_dimension_numbers<[1], [0], [0], [1], [0, 0, 1, 1], [], []>} : vector<2x128xf32>, vector<128x8xf32>, vector<2x8xf32> -> vector<2x8xf32>
    %10 = math.rsqrt %9 : vector<2x8xf32>
    %11 = arith.mulf %9, %10 : vector<2x8xf32>
    %cst_9 = arith.constant 1.000000e+00 : f32
    %12 = vector.broadcast %cst_9 : f32 to vector<2x8xf32>
    %13 = arith.addf %12, %9 : vector<2x8xf32>
    %14 = arith.divf %11, %13 : vector<2x8xf32>
    %cst_10 = arith.constant dense<0.000000e+00> : vector<2x128xf32>
    %15 = tpu.matmul %14, %1, %cst_10 {dimension_numbers = #tpu.dot_dimension_numbers<[1], [0], [0], [1], [0, 0, 1, 1], [], []>} : vector<2x8xf32>, vector<8x128xf32>, vector<2x128xf32> -> vector<2x128xf32>
    %16 = arith.mulf %7, %15 : vector<2x128xf32>
    %c0_11 = arith.constant 0 : index
    %c0_12 = arith.constant 0 : index
    %17 = vector.load %arg1[%c0_11, %c0_12] : memref<16x8xf32, #tpu.memory_space<vmem>>, vector<16x8xf32>
    %18 = vector.shape_cast %17 : vector<16x8xf32> to vector<1x16x8xf32>
    %19 = vector.shape_cast %16 : vector<2x128xf32> to vector<2x1x128xf32>
    %20 = vector.broadcast %19 : vector<2x1x128xf32> to vector<2x16x128xf32>
    %21 = arith.mulf %0, %20 : vector<2x16x128xf32>
    %22 = vector.shape_cast %21 : vector<2x16x128xf32> to vector<32x128xf32>
    %cst_13 = arith.constant dense<0.000000e+00> : vector<32x8xf32>
    %23 = tpu.matmul %22, %2, %cst_13 {dimension_numbers = #tpu.dot_dimension_numbers<[1], [0], [0], [1], [0, 0, 1, 1], [], []>} : vector<32x128xf32>, vector<128x8xf32>, vector<32x8xf32> -> vector<32x8xf32>
    %24 = vector.shape_cast %23 : vector<32x8xf32> to vector<2x16x8xf32>
    %25 = vector.broadcast %18 : vector<1x16x8xf32> to vector<2x16x8xf32>
    %26 = arith.addf %25, %24 : vector<2x16x8xf32>
    %cst_14 = arith.constant dense<0xFF800000> : vector<2x16xf32>
    %27 = vector.multi_reduction <maximumf>, %26, %cst_14 [2] : vector<2x16x8xf32> to vector<2x16xf32>
    %28 = vector.shape_cast %27 : vector<2x16xf32> to vector<2x16x1xf32>
    %29 = vector.broadcast %28 : vector<2x16x1xf32> to vector<2x16x8xf32>
    %30 = arith.subf %26, %29 : vector<2x16x8xf32>
    %31 = math.exp %30 : vector<2x16x8xf32>
    %cst_15 = arith.constant dense<0.000000e+00> : vector<2x16xf32>
    %32 = vector.multi_reduction <add>, %31, %cst_15 [2] : vector<2x16x8xf32> to vector<2x16xf32>
    %33 = vector.shape_cast %32 : vector<2x16xf32> to vector<2x16x1xf32>
    %cst_16 = arith.constant 1.000000e+00 : f32
    %34 = vector.broadcast %cst_16 : f32 to vector<2x16x1xf32>
    %35 = arith.divf %34, %33 : vector<2x16x1xf32>
    %36 = vector.broadcast %35 : vector<2x16x1xf32> to vector<2x16x8xf32>
    %37 = arith.mulf %31, %36 : vector<2x16x8xf32>
    %38 = vector.shape_cast %37 : vector<2x16x8xf32> to vector<32x8xf32>
    %cst_17 = arith.constant dense<0.000000e+00> : vector<32x128xf32>
    %39 = tpu.matmul %38, %1, %cst_17 {dimension_numbers = #tpu.dot_dimension_numbers<[1], [0], [0], [1], [0, 0, 1, 1], [], []>} : vector<32x8xf32>, vector<8x128xf32>, vector<32x128xf32> -> vector<32x128xf32>
    %40 = vector.shape_cast %39 : vector<32x128xf32> to vector<2x16x128xf32>
    %41 = arith.mulf %40, %0 : vector<2x16x128xf32>
    %cst_18 = arith.constant dense<0.000000e+00> : vector<2x128xf32>
    %42 = vector.multi_reduction <add>, %41, %cst_18 [1] : vector<2x16x128xf32> to vector<2x128xf32>
    %43 = arith.mulf %42, %42 : vector<2x128xf32>
    %cst_19 = arith.constant dense<0.000000e+00> : vector<2x8xf32>
    %44 = tpu.matmul %43, %2, %cst_19 {dimension_numbers = #tpu.dot_dimension_numbers<[1], [0], [0], [1], [0, 0, 1, 1], [], []>} : vector<2x128xf32>, vector<128x8xf32>, vector<2x8xf32> -> vector<2x8xf32>
    %45 = math.rsqrt %44 : vector<2x8xf32>
    %46 = arith.mulf %44, %45 : vector<2x8xf32>
    %cst_20 = arith.constant 1.000000e+00 : f32
    %47 = vector.broadcast %cst_20 : f32 to vector<2x8xf32>
    %48 = arith.addf %47, %44 : vector<2x8xf32>
    %49 = arith.divf %46, %48 : vector<2x8xf32>
    %cst_21 = arith.constant dense<0.000000e+00> : vector<2x128xf32>
    %50 = tpu.matmul %49, %1, %cst_21 {dimension_numbers = #tpu.dot_dimension_numbers<[1], [0], [0], [1], [0, 0, 1, 1], [], []>} : vector<2x8xf32>, vector<8x128xf32>, vector<2x128xf32> -> vector<2x128xf32>
    %51 = arith.mulf %42, %50 : vector<2x128xf32>
    %52 = vector.shape_cast %51 : vector<2x128xf32> to vector<2x1x128xf32>
    %53 = vector.broadcast %52 : vector<2x1x128xf32> to vector<2x16x128xf32>
    %54 = arith.mulf %0, %53 : vector<2x16x128xf32>
    %55 = vector.shape_cast %54 : vector<2x16x128xf32> to vector<32x128xf32>
    %cst_22 = arith.constant dense<0.000000e+00> : vector<32x8xf32>
    %56 = tpu.matmul %55, %2, %cst_22 {dimension_numbers = #tpu.dot_dimension_numbers<[1], [0], [0], [1], [0, 0, 1, 1], [], []>} : vector<32x128xf32>, vector<128x8xf32>, vector<32x8xf32> -> vector<32x8xf32>
    %57 = vector.shape_cast %56 : vector<32x8xf32> to vector<2x16x8xf32>
    %58 = arith.addf %26, %57 : vector<2x16x8xf32>
    %cst_23 = arith.constant dense<0xFF800000> : vector<2x16xf32>
    %59 = vector.multi_reduction <maximumf>, %58, %cst_23 [2] : vector<2x16x8xf32> to vector<2x16xf32>
    %60 = vector.shape_cast %59 : vector<2x16xf32> to vector<2x16x1xf32>
    %61 = vector.broadcast %60 : vector<2x16x1xf32> to vector<2x16x8xf32>
    %62 = arith.subf %58, %61 : vector<2x16x8xf32>
    %63 = math.exp %62 : vector<2x16x8xf32>
    %cst_24 = arith.constant dense<0.000000e+00> : vector<2x16xf32>
    %64 = vector.multi_reduction <add>, %63, %cst_24 [2] : vector<2x16x8xf32> to vector<2x16xf32>
    %65 = vector.shape_cast %64 : vector<2x16xf32> to vector<2x16x1xf32>
    %cst_25 = arith.constant 1.000000e+00 : f32
    %66 = vector.broadcast %cst_25 : f32 to vector<2x16x1xf32>
    %67 = arith.divf %66, %65 : vector<2x16x1xf32>
    %68 = vector.broadcast %67 : vector<2x16x1xf32> to vector<2x16x8xf32>
    %69 = arith.mulf %63, %68 : vector<2x16x8xf32>
    %70 = vector.shape_cast %69 : vector<2x16x8xf32> to vector<32x8xf32>
    %cst_26 = arith.constant dense<0.000000e+00> : vector<32x128xf32>
    %71 = tpu.matmul %70, %1, %cst_26 {dimension_numbers = #tpu.dot_dimension_numbers<[1], [0], [0], [1], [0, 0, 1, 1], [], []>} : vector<32x8xf32>, vector<8x128xf32>, vector<32x128xf32> -> vector<32x128xf32>
    %72 = vector.shape_cast %71 : vector<32x128xf32> to vector<2x16x128xf32>
    %73 = arith.mulf %72, %0 : vector<2x16x128xf32>
    %cst_27 = arith.constant dense<0.000000e+00> : vector<2x128xf32>
    %74 = vector.multi_reduction <add>, %73, %cst_27 [1] : vector<2x16x128xf32> to vector<2x128xf32>
    %75 = arith.mulf %74, %74 : vector<2x128xf32>
    %cst_28 = arith.constant dense<0.000000e+00> : vector<2x8xf32>
    %76 = tpu.matmul %75, %2, %cst_28 {dimension_numbers = #tpu.dot_dimension_numbers<[1], [0], [0], [1], [0, 0, 1, 1], [], []>} : vector<2x128xf32>, vector<128x8xf32>, vector<2x8xf32> -> vector<2x8xf32>
    %77 = math.rsqrt %76 : vector<2x8xf32>
    %78 = arith.mulf %76, %77 : vector<2x8xf32>
    %cst_29 = arith.constant 1.000000e+00 : f32
    %79 = vector.broadcast %cst_29 : f32 to vector<2x8xf32>
    %80 = arith.addf %79, %76 : vector<2x8xf32>
    %81 = arith.divf %78, %80 : vector<2x8xf32>
    %cst_30 = arith.constant dense<0.000000e+00> : vector<2x128xf32>
    %82 = tpu.matmul %81, %1, %cst_30 {dimension_numbers = #tpu.dot_dimension_numbers<[1], [0], [0], [1], [0, 0, 1, 1], [], []>} : vector<2x8xf32>, vector<8x128xf32>, vector<2x128xf32> -> vector<2x128xf32>
    %83 = arith.mulf %74, %82 : vector<2x128xf32>
    %84 = vector.shape_cast %83 : vector<2x128xf32> to vector<2x1x128xf32>
    %85 = vector.broadcast %84 : vector<2x1x128xf32> to vector<2x16x128xf32>
    %86 = arith.mulf %0, %85 : vector<2x16x128xf32>
    %87 = vector.shape_cast %86 : vector<2x16x128xf32> to vector<32x128xf32>
    %cst_31 = arith.constant dense<0.000000e+00> : vector<32x8xf32>
    %88 = tpu.matmul %87, %2, %cst_31 {dimension_numbers = #tpu.dot_dimension_numbers<[1], [0], [0], [1], [0, 0, 1, 1], [], []>} : vector<32x128xf32>, vector<128x8xf32>, vector<32x8xf32> -> vector<32x8xf32>
    %89 = vector.shape_cast %88 : vector<32x8xf32> to vector<2x16x8xf32>
    %90 = arith.addf %58, %89 : vector<2x16x8xf32>
    %cst_32 = arith.constant dense<0xFF800000> : vector<2x16xf32>
    %91 = vector.multi_reduction <maximumf>, %90, %cst_32 [2] : vector<2x16x8xf32> to vector<2x16xf32>
    %92 = vector.shape_cast %91 : vector<2x16xf32> to vector<2x16x1xf32>
    %93 = vector.broadcast %92 : vector<2x16x1xf32> to vector<2x16x8xf32>
    %94 = arith.subf %90, %93 : vector<2x16x8xf32>
    %95 = math.exp %94 : vector<2x16x8xf32>
    %cst_33 = arith.constant dense<0.000000e+00> : vector<2x16xf32>
    %96 = vector.multi_reduction <add>, %95, %cst_33 [2] : vector<2x16x8xf32> to vector<2x16xf32>
    %97 = vector.shape_cast %96 : vector<2x16xf32> to vector<2x16x1xf32>
    %cst_34 = arith.constant 1.000000e+00 : f32
    %98 = vector.broadcast %cst_34 : f32 to vector<2x16x1xf32>
    %99 = arith.divf %98, %97 : vector<2x16x1xf32>
    %100 = vector.broadcast %99 : vector<2x16x1xf32> to vector<2x16x8xf32>
    %101 = arith.mulf %95, %100 : vector<2x16x8xf32>
    %102 = vector.shape_cast %101 : vector<2x16x8xf32> to vector<32x8xf32>
    %cst_35 = arith.constant dense<0.000000e+00> : vector<32x128xf32>
    %103 = tpu.matmul %102, %1, %cst_35 {dimension_numbers = #tpu.dot_dimension_numbers<[1], [0], [0], [1], [0, 0, 1, 1], [], []>} : vector<32x8xf32>, vector<8x128xf32>, vector<32x128xf32> -> vector<32x128xf32>
    %104 = vector.shape_cast %103 : vector<32x128xf32> to vector<2x16x128xf32>
    %105 = arith.mulf %104, %0 : vector<2x16x128xf32>
    %cst_36 = arith.constant dense<0.000000e+00> : vector<2x128xf32>
    %106 = vector.multi_reduction <add>, %105, %cst_36 [1] : vector<2x16x128xf32> to vector<2x128xf32>
    %107 = arith.mulf %106, %106 : vector<2x128xf32>
    %cst_37 = arith.constant dense<0.000000e+00> : vector<2x8xf32>
    %108 = tpu.matmul %107, %2, %cst_37 {dimension_numbers = #tpu.dot_dimension_numbers<[1], [0], [0], [1], [0, 0, 1, 1], [], []>} : vector<2x128xf32>, vector<128x8xf32>, vector<2x8xf32> -> vector<2x8xf32>
    %109 = math.rsqrt %108 : vector<2x8xf32>
    %110 = arith.mulf %108, %109 : vector<2x8xf32>
    %cst_38 = arith.constant 1.000000e+00 : f32
    %111 = vector.broadcast %cst_38 : f32 to vector<2x8xf32>
    %112 = arith.addf %111, %108 : vector<2x8xf32>
    %113 = arith.divf %110, %112 : vector<2x8xf32>
    %cst_39 = arith.constant dense<0.000000e+00> : vector<2x128xf32>
    %114 = tpu.matmul %113, %1, %cst_39 {dimension_numbers = #tpu.dot_dimension_numbers<[1], [0], [0], [1], [0, 0, 1, 1], [], []>} : vector<2x8xf32>, vector<8x128xf32>, vector<2x128xf32> -> vector<2x128xf32>
    %115 = arith.mulf %106, %114 : vector<2x128xf32>
    %c0_40 = arith.constant 0 : index
    %c0_41 = arith.constant 0 : index
    %116 = vector.load %arg6[%c0_40, %c0_41] : memref<2x128xf32, #tpu.memory_space<vmem>>, vector<2x128xf32>
    tpu.vector_store %arg6[%c0_40, %c0_41], %115 {strides = array<i32>} : memref<2x128xf32, #tpu.memory_space<vmem>>, vector<2x128xf32>,
    return
  }
  func.func @transform_0(%arg0: i32) -> (i32, i32) {
    %c0_i32 = arith.constant 0 : i32
    %c0_i32_0 = arith.constant 0 : i32
    %c0_i32_1 = arith.constant 0 : i32
    return %c0_i32, %c0_i32_0 : i32, i32
  }
  func.func @transform_1(%arg0: i32) -> (i32, i32) {
    %c0_i32 = arith.constant 0 : i32
    %c0_i32_0 = arith.constant 0 : i32
    %c0_i32_1 = arith.constant 0 : i32
    return %c0_i32, %c0_i32_0 : i32, i32
  }
  func.func @transform_2(%arg0: i32) -> (i32, i32) {
    %c0_i32 = arith.constant 0 : i32
    %c0_i32_0 = arith.constant 0 : i32
    %c0_i32_1 = arith.constant 0 : i32
    return %c0_i32, %c0_i32_0 : i32, i32
  }
  func.func @transform_3(%arg0: i32) -> (i32, i32) {
    %c0_i32 = arith.constant 0 : i32
    %c0_i32_0 = arith.constant 0 : i32
    %c0_i32_1 = arith.constant 0 : i32
    return %c0_i32, %c0_i32_0 : i32, i32
  }
  func.func @transform_4(%arg0: i32) -> (i32, i32, i32) {
    %c0_i32 = arith.constant 0 : i32
    %c0_i32_0 = arith.constant 0 : i32
    %c0_i32_1 = arith.constant 0 : i32
    return %arg0, %c0_i32, %c0_i32_0 : i32, i32, i32
  }
  func.func @transform_5(%arg0: i32) -> (i32, i32) {
    %c0_i32 = arith.constant 0 : i32
    %c0_i32_0 = arith.constant 0 : i32
    return %arg0, %c0_i32 : i32, i32
  }
}

</mosaic_0001>

<bundles_post_ra>
// kernel: tpu_custom_call.1
= control target key start
LH: loop header
LB: loop body
LE: loop exit
PB: predicated region body
PF: predicated region fallthrough
CT: control target
= control target key end

     0   :  { %s1607_s0 = inlined_call_operand.vmem [shape: f32[16,8], index: 0, kind: input, shape index: {}]   ;;  %s1608_s1 = inlined_call_operand.vmem [shape: f32[16,128], index: 1, kind: input, shape index: {}]   ;;  %s1609_s2 = inlined_call_operand.vmem [shape: f32[8,128], index: 2, kind: input, shape index: {}]   ;;  %s1610_s3 = inlined_call_operand.vmem [shape: f32[128,8], index: 3, kind: input, shape index: {}]   ;;  %s1611_s4 = inlined_call_operand.vmem [shape: f32[2,16,128], index: 4, kind: input, shape index: {}]   ;;  %s1612_s5 = inlined_call_operand.hbm [shape: f32[2,128], index: 5, kind: output, shape index: {}]  }
   0x1   :  { %v1168_v0 = vld [vmem:[%s1610_s3 + $0x78] sm:$0xff]  ;;  %v1173_v1 = vld [vmem:[%s1610_s3 + $0x70] sm:$0xff]  ;;  %v1180_v2 = vld [vmem:[%s1610_s3 + $0x68] sm:$0xff] }
   0x2   :  { %69 = vmatpush.msra.mxu0 %v1168_v0  ;;  %352 = vmatpush.msra.mxu1 %v1168_v0  ;;  %v1187_v3 = vld [vmem:[%s1610_s3 + $0x60] sm:$0xff]  ;;  %v1193_v4 = vld [vmem:[%s1610_s3 + $0x58] sm:$0xff]  ;;  %v1203_v6 = vld [vmem:[%s1611_s4 + $0x8] sm:$0xff] }
   0x3   :  { %v1198_v5 = vld [vmem:[%s1611_s4] sm:$0xff]  ;;  %v1209_v7 = vld [vmem:[%s1611_s4 + $0x10] sm:$0xff]  ;;  %v1214_v8 = vld [vmem:[%s1611_s4 + $0x18] sm:$0xff] }
   0x4   :  { %70 = vmatpush.msra.mxu0 %v1173_v1  ;;  %353 = vmatpush.msra.mxu1 %v1173_v1  ;;  %v42_v9 = vld [vmem:[%s1608_s1] sm:$0xff]  ;;  %v43_v10 = vld [vmem:[%s1608_s1 + $0x8] sm:$0xff] }
   0x5   :  { %v44_v11 = vmul.f32 %v42_v9, %v1198_v5  ;;  %v46_v12 = vmul.f32 %v42_v9, %v1209_v7 }
   0x6   :  { %71 = vmatpush.msra.mxu0 %v1180_v2  ;;  %354 = vmatpush.msra.mxu1 %v1180_v2 }
   0x8   :  { %72 = vmatpush.msra.mxu0 %v1187_v3  ;;  %355 = vmatpush.msra.mxu1 %v1187_v3 }
   0x9   :  { %10 = vsyncpa [#allocation3], 0  ;;  %v1229_v13 = vld [vmem:[%s1610_s3 + $0x50] sm:$0xff]  ;;  %v45_v14 = vmul.f32 %v43_v10, %v1203_v6  ;;  %v47_v15 = vmul.f32 %v43_v10, %v1214_v8  ;;  %v1238_v16 = vld [vmem:[%s1610_s3 + $0x48] sm:$0xff]  ;;  %vm66_vm0 = vcmask 1041409   ;;  %vm116_vm8 = vcmask 64512  }
   0xa   :  { %73 = vmatpush.msra.mxu0 %v1193_v4  ;;  %356 = vmatpush.msra.mxu1 %v1193_v4  ;;  %v1245_v19 = vld [vmem:[%s1610_s3 + $0x40] sm:$0xff]  ;;  %v1252_v22 = vld [vmem:[%s1610_s3 + $0x38] sm:$0xff]  ;;  %v1259_v25 = vld [vmem:[%s1610_s3 + $0x30] sm:$0xff]  ;;  %s1001_s22 = sshll.u32 %s1612_s5, 4  ;;  %s1002_s22 = int_to_ptr.hbm [resolvable:$true] %s1001_s22 }
   0xb   :  { %v48_v17 = vadd.f32 %v45_v14, %v44_v11  ;;  %v55_v18 = vadd.f32 %v47_v15, %v46_v12  ;;  %v1266_v28 = vld [vmem:[%s1610_s3 + $0x28] sm:$0xff]  ;;  %v1273_v31 = vld [vmem:[%s1610_s3 + $0x20] sm:$0xff]  ;;  %v1280_v34 = vld [vmem:[%s1610_s3 + $0x18] sm:$0xff] }
   0xc   :  { %74 = vmatpush.msra.mxu0 %v1229_v13  ;;  %357 = vmatpush.msra.mxu1 %v1229_v13  ;;  %v1291_v37 = vld [vmem:[%s1610_s3 + $0x10] sm:$0xff]  ;;  %v1302_v40 = vld [vmem:[%s1610_s3 + $0x8] sm:$0xff]  ;;  %v1309_v41 = vld [vmem:[%s1610_s3] sm:$0xff] }
   0xd   :  { %v49_v20 = vrot.slane %v48_v17, 4  ;;  %v56_v21 = vrot.slane %v55_v18, 4  ;;  %v1335_v43 = vld [vmem:[%s1609_s2] sm:$0xff] }
   0xe   :  { %75 = vmatpush.msra.mxu0 %v1238_v16  ;;  %358 = vmatpush.msra.mxu1 %v1238_v16 }
   0xf   :  { %v50_v23 = vadd.f32 %v49_v20, %v48_v17  ;;  %v57_v24 = vadd.f32 %v56_v21, %v55_v18  ;;  %135 = vmatpush.msra.mxu2 %v1335_v43  ;;  %314 = vmatpush.msra.mxu3 %v1335_v43 }
  0x10   :  { %76 = vmatpush.msra.mxu0 %v1245_v19  ;;  %359 = vmatpush.msra.mxu1 %v1245_v19 }
  0x11   :  { %v51_v26 = vrot.slane %v50_v23, 2  ;;  %v58_v27 = vrot.slane %v57_v24, 2  ;;  %154 = vmatpush.msrb.mxu2 %v1168_v0  ;;  %417 = vmatpush.msrb.mxu3 %v1335_v43 }
  0x12   :  { %77 = vmatpush.msra.mxu0 %v1252_v22  ;;  %360 = vmatpush.msra.mxu1 %v1252_v22 }
  0x13   :  { %v52_v29 = vadd.f32 %v51_v26, %v50_v23  ;;  %v59_v30 = vadd.f32 %v58_v27, %v57_v24  ;;  %155 = vmatpush.msrb.mxu2 %v1173_v1  ;;  %v146_v24 = vld [vmem:[%s1607_s0] sm:$0xff] }
  0x14   :  { %78 = vmatpush.msra.mxu0 %v1259_v25  ;;  %361 = vmatpush.msra.mxu1 %v1259_v25 }
  0x15   :  { %v53_v32 = vrot.slane %v52_v29, 1  ;;  %v60_v33 = vrot.slane %v59_v30, 1  ;;  %156 = vmatpush.msrb.mxu2 %v1180_v2 }
  0x16   :  { %79 = vmatpush.msra.mxu0 %v1266_v28  ;;  %362 = vmatpush.msra.mxu1 %v1266_v28 }
  0x17   :  { %v1282_v35 = vadd.f32 %v53_v32, %v52_v29  ;;  %v1284_v36 = vadd.f32 %v60_v33, %v59_v30  ;;  %157 = vmatpush.msrb.mxu2 %v1187_v3  ;;  %v147_v30 = vld [vmem:[%s1607_s0 + $0x8] sm:$0xff] }
  0x18   :  { %80 = vmatpush.msra.mxu0 %v1273_v31  ;;  %363 = vmatpush.msra.mxu1 %v1273_v31 }
  0x19   :  { %v62_v38 = vmul.f32 %v1282_v35, %v1282_v35  ;;  %v63_v39 = vmul.f32 %v1284_v36, %v1284_v36  ;;  %158 = vmatpush.msrb.mxu2 %v1193_v4 }
  0x1a   :  { %81 = vmatpush.msra.mxu0 %v1280_v34  ;;  %364 = vmatpush.msra.mxu1 %v1280_v34 }
  0x1b   :  { %v67_v42 = vsel %vm66_vm0, %v63_v39, %v62_v38  ;;  %159 = vmatpush.msrb.mxu2 %v1229_v13 }
  0x1c   :  { %82 = vmatpush.msra.mxu0 %v1291_v37  ;;  %365 = vmatpush.msra.mxu1 %v1291_v37 }
  0x1d   :  { %160 = vmatpush.msrb.mxu2 %v1238_v16 }
  0x1e   :  { %83 = vmatpush.msra.mxu0 %v1302_v40  ;;  %366 = vmatpush.msra.mxu1 %v1302_v40 }
  0x1f   :  { %161 = vmatpush.msrb.mxu2 %v1245_v19 }
  0x20   :  { %84 = vmatpush.msra.mxu0 %v1309_v41  ;;  %367 = vmatpush.msra.mxu1 %v1309_v41 }
  0x21   :  { %85 = vmatmul.f32.vlgmr.msra.gmra.mxu0 %v67_v42  ;;  %162 = vmatpush.msrb.mxu2 %v1252_v22 }
  0x22   :  { %434 = vmatpush.msrb.mxu0 %v1168_v0  ;;  %594 = vmatpush.msrb.mxu1 %v1335_v43 }
  0x23   :  { %163 = vmatpush.msrb.mxu2 %v1259_v25 }
  0x24   :  { %435 = vmatpush.msrb.mxu0 %v1173_v1 }
  0x25   :  { %164 = vmatpush.msrb.mxu2 %v1266_v28 }
  0x26   :  { %436 = vmatpush.msrb.mxu0 %v1180_v2 }
  0x27   :  { %165 = vmatpush.msrb.mxu2 %v1273_v31 }
  0x28   :  { %437 = vmatpush.msrb.mxu0 %v1187_v3 }
  0x29   :  { %166 = vmatpush.msrb.mxu2 %v1280_v34 }
  0x2a   :  { %438 = vmatpush.msrb.mxu0 %v1193_v4 }
  0x2b   :  { %167 = vmatpush.msrb.mxu2 %v1291_v37 }
  0x2c   :  { %439 = vmatpush.msrb.mxu0 %v1229_v13 }
  0x2d   :  { %168 = vmatpush.msrb.mxu2 %v1302_v40 }
  0x2e   :  { %440 = vmatpush.msrb.mxu0 %v1238_v16 }
  0x2f   :  { %169 = vmatpush.msrb.mxu2 %v1309_v41 }
  0x30   :  { %441 = vmatpush.msrb.mxu0 %v1245_v19 }
  0x32   :  { %442 = vmatpush.msrb.mxu0 %v1252_v22 }
  0x34   :  { %443 = vmatpush.msrb.mxu0 %v1259_v25 }
  0x36   :  { %444 = vmatpush.msrb.mxu0 %v1266_v28 }
  0x38   :  { %445 = vmatpush.msrb.mxu0 %v1273_v31 }
  0x3a   :  { %446 = vmatpush.msrb.mxu0 %v1280_v34 }
  0x3c   :  { %447 = vmatpush.msrb.mxu0 %v1291_v37 }
  0x3e   :  { %448 = vmatpush.msrb.mxu0 %v1302_v40 }
  0x40   :  { %449 = vmatpush.msrb.mxu0 %v1309_v41 }
  0x9e   :  { %v86_v44 = vpop.f32.mrf.mxu0 }
  0x9f   :  { %1027 = vrsqrt.f32 %v86_v44  ;;  %v100_v45 = vadd.f32 1.0, %v86_v44  ;;  %vm95_vm3 = vweird.f32 %v86_v44 }
  0xa1   :  { %1029 = vrcp.f32 %v100_v45  ;;  %v112_v53 = vand.u32 2147483648, %v100_v45  ;;  %v110_v56 = vand.u32 2147483647, %v100_v45  ;;  %vm106_vm5 = vweird.f32 %v100_v45 }
  0xa3   :  { %v113_v59 = vor.u32 1.1754944e-38, %v112_v53  ;;  %vm111_vm7 = vcmp.eq.f32.partialorder %v110_v56, 8.507059e+37 }
  0xa5   :  { %v1028_v46 = vpop.eup %1027 }
  0xa6   :  { %v90_v47 = vmul.f32 %v1028_v46, %v86_v44  ;;  %vm96_vm1 = vweird.f32 %v1028_v46 }
  0xa7   :  { %v1030_v48 = vpop.eup %1029  ;;  %vm97_vm4 = vmor %vm95_vm3, %vm96_vm1 }
  0xa8   :  { %v91_v49 = vmul.f32 %v1028_v46, %v90_v47  ;;  %v102_v50 = vmul.f32 %v1030_v48, %v100_v45  ;;  %vm107_vm2 = vweird.f32 %v1030_v48 }
  0xa9   :  { %vm108_vm6 = vmor %vm106_vm5, %vm107_vm2 }
  0xaa   :  { %v92_v51 = vmul.f32 0.5, %v91_v49  ;;  %v103_v52 = vsub.f32 1.0, %v102_v50 }
  0xac   :  { %v93_v54 = vsub.f32 1.5, %v92_v51  ;;  %v104_v55 = vmul.f32 %v1030_v48, %v103_v52 }
  0xae   :  { %v94_v57 = vmul.f32 %v1028_v46, %v93_v54  ;;  %v105_v58 = vadd.f32 %v1030_v48, %v104_v55 }
  0xb0   :  { %v98_v60 = vsel %vm97_vm4, %v1028_v46, %v94_v57  ;;  %v109_v61 = vsel %vm108_vm6, %v1030_v48, %v105_v58 }
  0xb1   :  { %v99_v62 = vmul.f32 %v98_v60, %v86_v44  ;;  %v114_v63 = vsel %vm111_vm7, %v113_v59, %v109_v61 }
  0xb3   :  { %v115_v9 = vmul.f32 %v114_v63, %v99_v62 }
  0xb5   :  { %1010 = vmatmul.msk.f32.vlgmr.msra.gmra.mxu2 %vm116_vm8, %v115_v9 }
  0xb6   :  { %632 = vmatpush.msra.mxu2 %v1168_v0 }
  0xb8   :  { %633 = vmatpush.msra.mxu2 %v1173_v1 }
  0xba   :  { %634 = vmatpush.msra.mxu2 %v1180_v2 }
  0xbc   :  { %635 = vmatpush.msra.mxu2 %v1187_v3 }
  0xbe   :  { %636 = vmatpush.msra.mxu2 %v1193_v4 }
  0xc0   :  { %637 = vmatpush.msra.mxu2 %v1229_v13 }
  0xc2   :  { %638 = vmatpush.msra.mxu2 %v1238_v16 }
  0xc4   :  { %639 = vmatpush.msra.mxu2 %v1245_v19 }
  0xc6   :  { %640 = vmatpush.msra.mxu2 %v1252_v22 }
  0xc8   :  { %641 = vmatpush.msra.mxu2 %v1259_v25 }
  0xca   :  { %642 = vmatpush.msra.mxu2 %v1266_v28 }
  0xcc   :  { %643 = vmatpush.msra.mxu2 %v1273_v31 }
  0xce   :  { %644 = vmatpush.msra.mxu2 %v1280_v34 }
  0xd0   :  { %645 = vmatpush.msra.mxu2 %v1291_v37 }
  0xd2   :  { %646 = vmatpush.msra.mxu2 %v1302_v40 }
  0xd4   :  { %647 = vmatpush.msra.mxu2 %v1309_v41 }
 0x138   :  { %v137_v10 = vpop.f32.mrf.mxu2 }
 0x139   :  { %v144_v11 = vmul.f32 %v137_v10, %v1282_v35  ;;  %v141_v15 = vrot.slane %v137_v10, 1 }
 0x13b   :  { %v148_v12 = vperm.slane %v144_v11, 0  ;;  %v145_v17 = vmul.f32 %v141_v15, %v1284_v36 }
 0x13d   :  { %v150_v14 = vmul.f32 %v148_v12, %v1198_v5  ;;  %v151_v18 = vmul.f32 %v148_v12, %v1203_v6  ;;  %v149_v20 = vperm.slane %v145_v17, 0 }
 0x13f   :  { %170 = vmatmul.f32.vlgmr.msrb.gmra.mxu2 %v150_v14  ;;  %v152_v21 = vmul.f32 %v149_v20, %v1209_v7  ;;  %v153_v23 = vmul.f32 %v149_v20, %v1214_v8 }
 0x140   :  { %977 = vmatpush.msrb.mxu2 %v1335_v43 }
 0x147   :  { %173 = vmatmul.f32.gmra.mxu2 %v151_v18 }
 0x14f   :  { %176 = vmatmul.f32.gmra.mxu2 %v152_v21 }
 0x157   :  { %179 = vmatmul.f32.gmra.mxu2 %v153_v23 }
 0x1c2   :  { %v171_v26 = vpop.f32.mrf.mxu2 }
 0x1c3   :  { %v1384_v27 = vadd.f32 %v171_v26, %v146_v24 }
 0x1c5   :  { %v187_v29 = vsel %vm116_vm8, %v1384_v27, -inf }
 0x1c6   :  { %188 = vmax.xlane.f32.xlu0 %v187_v29 }
 0x1ca   :  { %v174_v32 = vpop.f32.mrf.mxu2 }
 0x1cb   :  { %v1391_v33 = vadd.f32 %v174_v32, %v147_v30 }
 0x1cd   :  { %v190_v35 = vsel %vm116_vm8, %v1391_v33, -inf }
 0x1ce   :  { %191 = vmax.xlane.f32.xlu0 %v190_v35 }
 0x1d2   :  { %v177_v36 = vpop.f32.mrf.mxu2 }
 0x1d3   :  { %v1395_v38 = vadd.f32 %v177_v36, %v146_v24 }
 0x1d5   :  { %v193_v39 = vsel %vm116_vm8, %v1395_v38, -inf }
 0x1d6   :  { %194 = vmax.xlane.f32.xlu1 %v193_v39 }
 0x1da   :  { %v180_v42 = vpop.f32.mrf.mxu2 }
 0x1db   :  { %v1399_v44 = vadd.f32 %v180_v42, %v147_v30 }
 0x1dd   :  { %v196_v45 = vsel %vm116_vm8, %v1399_v44, -inf }
 0x1de   :  { %197 = vmax.xlane.f32.xlu1 %v196_v45 }
 0x239   :  { %v189_v46 = vpop.xlane.xlu0 %188 }
 0x23a   :  { %v199_v47 = vsub.f32 %v1384_v27, %v189_v46 }
 0x23c   :  { %v203_v48 = vmul.f32 1.442695, %v199_v47 }
 0x23e   :  { %1031 = vpow2.f32 %v203_v48 }
 0x241   :  { %v192_v49 = vpop.xlane.xlu0 %191 }
 0x242   :  { %v200_v50 = vsub.f32 %v1391_v33, %v192_v49 }
 0x244   :  { %v1032_v51 = vpop.eup %1031  ;;  %v205_v52 = vmul.f32 1.442695, %v200_v50 }
 0x245   :  { %v211_v53 = vsel %vm116_vm8, %v1032_v51, 0.0 }
 0x246   :  { %1033 = vpow2.f32 %v205_v52  ;;  %212 = vadd.xlane.f32.xlu2 %v211_v53 }
 0x249   :  { %v195_v54 = vpop.xlane.xlu1 %194 }
 0x24a   :  { %v201_v55 = vsub.f32 %v1395_v38, %v195_v54 }
 0x24c   :  { %v1034_v56 = vpop.eup %1033  ;;  %v207_v57 = vmul.f32 1.442695, %v201_v55 }
 0x24d   :  { %v214_v58 = vsel %vm116_vm8, %v1034_v56, 0.0 }
 0x24e   :  { %1035 = vpow2.f32 %v207_v57  ;;  %215 = vadd.xlane.f32.xlu2 %v214_v58 }
 0x251   :  { %v198_v59 = vpop.xlane.xlu1 %197 }
 0x252   :  { %v202_v60 = vsub.f32 %v1399_v44, %v198_v59 }
 0x254   :  { %v1409_v61 = vpop.eup %1035  ;;  %v209_v62 = vmul.f32 1.442695, %v202_v60 }
 0x255   :  { %v217_v63 = vsel %vm116_vm8, %v1409_v61, 0.0 }
 0x256   :  { %1037 = vpow2.f32 %v209_v62  ;;  %218 = vadd.xlane.f32.xlu0 %v217_v63 }
 0x25c   :  { %v1413_v9 = vpop.eup %1037 }
 0x25d   :  { %v220_v10 = vsel %vm116_vm8, %v1413_v9, 0.0 }
 0x25e   :  { %221 = vadd.xlane.f32.xlu1 %v220_v10 }
 0x2b9   :  { %v213_v11 = vpop.xlane.xlu2 %212 }
 0x2ba   :  { %1039 = vrcp.f32 %v213_v11  ;;  %v234_v18 = vand.u32 2147483648, %v213_v11  ;;  %v232_v21 = vand.u32 2147483647, %v213_v11  ;;  %vm228_vm10 = vweird.f32 %v213_v11 }
 0x2bc   :  { %v235_v26 = vor.u32 1.1754944e-38, %v234_v18  ;;  %vm233_vm12 = vcmp.eq.f32.partialorder %v232_v21, 8.507059e+37 }
 0x2c0   :  { %v1040_v12 = vpop.eup %1039 }
 0x2c1   :  { %v224_v14 = vmul.f32 %v1040_v12, %v213_v11  ;;  %v216_v15 = vpop.xlane.xlu2 %215  ;;  %vm229_vm9 = vweird.f32 %v1040_v12 }
 0x2c2   :  { %1041 = vrcp.f32 %v216_v15  ;;  %vm230_vm11 = vmor %vm228_vm10, %vm229_vm9  ;;  %v249_v42 = vand.u32 2147483648, %v216_v15  ;;  %v247_v46 = vand.u32 2147483647, %v216_v15  ;;  %vm243_vm14 = vweird.f32 %v216_v15 }
 0x2c3   :  { %v225_v17 = vsub.f32 1.0, %v224_v14 }
 0x2c4   :  { %v250_v49 = vor.u32 1.1754944e-38, %v249_v42  ;;  %vm248_vm1 = vcmp.eq.f32.partialorder %v247_v46, 8.507059e+37 }
 0x2c5   :  { %v226_v20 = vmul.f32 %v1040_v12, %v225_v17 }
 0x2c7   :  { %v227_v23 = vadd.f32 %v1040_v12, %v226_v20 }
 0x2c8   :  { %v1042_v24 = vpop.eup %1041 }
 0x2c9   :  { %v239_v29 = vmul.f32 %v1042_v24, %v216_v15  ;;  %v219_v30 = vpop.xlane.xlu0 %218  ;;  %v231_v32 = vsel %vm230_vm11, %v1040_v12, %v227_v23  ;;  %vm244_vm13 = vweird.f32 %v1042_v24 }
 0x2ca   :  { %1043 = vrcp.f32 %v219_v30  ;;  %v236_v35 = vsel %vm233_vm12, %v235_v26, %v231_v32  ;;  %vm245_vm15 = vmor %vm243_vm14, %vm244_vm13  ;;  %v264_v57 = vand.u32 2147483648, %v219_v30  ;;  %v262_v59 = vand.u32 2147483647, %v219_v30 }
 0x2cb   :  { %v240_v36 = vsub.f32 1.0, %v239_v29  ;;  %v283_v39 = vmul.f32 %v1032_v51, %v236_v35  ;;  %vm258_vm3 = vweird.f32 %v219_v30 }
 0x2cc   :  { %v265_v63 = vor.u32 1.1754944e-38, %v264_v57  ;;  %vm263_vm5 = vcmp.eq.f32.partialorder %v262_v59, 8.507059e+37 }
 0x2cd   :  { %v241_v45 = vmul.f32 %v1042_v24, %v240_v36  ;;  %1011 = vmatmul.msk.f32.vlgmr.msra.gmra.mxu3 %vm116_vm8, %v283_v39 }
 0x2ce   :  { %697 = vmatpush.msra.mxu3 %v1335_v43 }
 0x2cf   :  { %v242_v47 = vadd.f32 %v1042_v24, %v241_v45 }
 0x2d0   :  { %v1044_v48 = vpop.eup %1043 }
 0x2d1   :  { %v254_v50 = vmul.f32 %v1044_v48, %v219_v30  ;;  %v222_v52 = vpop.xlane.xlu1 %221  ;;  %v246_v53 = vsel %vm245_vm15, %v1042_v24, %v242_v47  ;;  %vm259_vm2 = vweird.f32 %v1044_v48 }
 0x2d2   :  { %1045 = vrcp.f32 %v222_v52  ;;  %v251_v54 = vsel %vm248_vm1, %v250_v49, %v246_v53  ;;  %vm260_vm4 = vmor %vm258_vm3, %vm259_vm2  ;;  %v279_v17 = vand.u32 2147483648, %v222_v52  ;;  %v277_v18 = vand.u32 2147483647, %v222_v52 }
 0x2d3   :  { %v255_v51 = vsub.f32 1.0, %v254_v50  ;;  %v284_v55 = vmul.f32 %v1034_v56, %v251_v54  ;;  %vm273_vm7 = vweird.f32 %v222_v52 }
 0x2d4   :  { %v280_v21 = vor.u32 1.1754944e-38, %v279_v17  ;;  %vm278_vm10 = vcmp.eq.f32.partialorder %v277_v18, 8.507059e+37 }
 0x2d5   :  { %v256_v58 = vmul.f32 %v1044_v48, %v255_v51  ;;  %1012 = vmatmul.msk.f32.gmra.mxu3 %vm116_vm8, %v284_v55 }
 0x2d7   :  { %v257_v60 = vadd.f32 %v1044_v48, %v256_v58 }
 0x2d8   :  { %v1046_v62 = vpop.eup %1045 }
 0x2d9   :  { %v269_v10 = vmul.f32 %v1046_v62, %v222_v52  ;;  %v261_v11 = vsel %vm260_vm4, %v1044_v48, %v257_v60  ;;  %vm274_vm6 = vweird.f32 %v1046_v62 }
 0x2da   :  { %v266_v12 = vsel %vm263_vm5, %v265_v63, %v261_v11  ;;  %vm275_vm9 = vmor %vm273_vm7, %vm274_vm6 }
 0x2db   :  { %v270_v14 = vsub.f32 1.0, %v269_v10  ;;  %v285_v15 = vmul.f32 %v1409_v61, %v266_v12 }
 0x2dd   :  { %v271_v56 = vmul.f32 %v1046_v62, %v270_v14  ;;  %1013 = vmatmul.msk.f32.gmra.mxu3 %vm116_vm8, %v285_v15 }
 0x2df   :  { %v272_v20 = vadd.f32 %v1046_v62, %v271_v56 }
 0x2e1   :  { %v276_v23 = vsel %vm275_vm9, %v1046_v62, %v272_v20 }
 0x2e2   :  { %v281_v24 = vsel %vm278_vm10, %v280_v21, %v276_v23 }
 0x2e3   :  { %v286_v26 = vmul.f32 %v1413_v9, %v281_v24 }
 0x2e5   :  { %1014 = vmatmul.msk.f32.gmra.mxu3 %vm116_vm8, %v286_v26 }
 0x350   :  { %v316_v29 = vpop.f32.mrf.mxu3 }
 0x351   :  { %v328_v32 = vmul.f32 %v316_v29, %v1198_v5 }
 0x358   :  { %v319_v30 = vpop.f32.mrf.mxu3 }
 0x359   :  { %v329_v61 = vmul.f32 %v319_v30, %v1203_v6 }
 0x35b   :  { %v332_v35 = vadd.f32 %v329_v61, %v328_v32 }
 0x35d   :  { %v333_v39 = vrot.slane %v332_v35, 4 }
 0x35f   :  { %v334_v42 = vadd.f32 %v333_v39, %v332_v35 }
 0x360   :  { %v322_v36 = vpop.f32.mrf.mxu3 }
 0x361   :  { %v335_v46 = vrot.slane %v334_v42, 2  ;;  %v330_v47 = vmul.f32 %v322_v36, %v1209_v7 }
 0x363   :  { %v336_v9 = vadd.f32 %v335_v46, %v334_v42 }
 0x365   :  { %v337_v53 = vrot.slane %v336_v9, 1 }
 0x367   :  { %v338_v57 = vadd.f32 %v337_v53, %v336_v9 }
 0x368   :  { %v325_v45 = vpop.f32.mrf.mxu3 }
 0x369   :  { %v331_v48 = vmul.f32 %v325_v45, %v1214_v8  ;;  %v346_v59 = vmul.f32 %v338_v57, %v338_v57 }
 0x36b   :  { %v339_v49 = vadd.f32 %v331_v48, %v330_v47 }
 0x36d   :  { %v340_v50 = vrot.slane %v339_v49, 4 }
 0x36f   :  { %v341_v52 = vadd.f32 %v340_v50, %v339_v49 }
 0x371   :  { %v342_v54 = vrot.slane %v341_v52, 2 }
 0x373   :  { %v343_v51 = vadd.f32 %v342_v54, %v341_v52 }
 0x375   :  { %v344_v55 = vrot.slane %v343_v51, 1 }
 0x377   :  { %v345_v58 = vadd.f32 %v344_v55, %v343_v51 }
 0x379   :  { %v347_v60 = vmul.f32 %v345_v58, %v345_v58 }
 0x37b   :  { %v350_v62 = vsel %vm66_vm0, %v347_v60, %v346_v59 }
 0x37c   :  { %368 = vmatmul.f32.vlgmr.msra.gmra.mxu1 %v350_v62 }
 0x37d   :  { %714 = vmatpush.msra.mxu1 %v1168_v0 }
 0x37f   :  { %715 = vmatpush.msra.mxu1 %v1173_v1 }
 0x381   :  { %716 = vmatpush.msra.mxu1 %v1180_v2 }
 0x383   :  { %717 = vmatpush.msra.mxu1 %v1187_v3 }
 0x385   :  { %718 = vmatpush.msra.mxu1 %v1193_v4 }
 0x387   :  { %719 = vmatpush.msra.mxu1 %v1229_v13 }
 0x389   :  { %720 = vmatpush.msra.mxu1 %v1238_v16 }
 0x38b   :  { %721 = vmatpush.msra.mxu1 %v1245_v19 }
 0x38d   :  { %722 = vmatpush.msra.mxu1 %v1252_v22 }
 0x38f   :  { %723 = vmatpush.msra.mxu1 %v1259_v25 }
 0x391   :  { %724 = vmatpush.msra.mxu1 %v1266_v28 }
 0x393   :  { %725 = vmatpush.msra.mxu1 %v1273_v31 }
 0x395   :  { %726 = vmatpush.msra.mxu1 %v1280_v34 }
 0x397   :  { %727 = vmatpush.msra.mxu1 %v1291_v37 }
 0x399   :  { %728 = vmatpush.msra.mxu1 %v1302_v40 }
 0x39b   :  { %729 = vmatpush.msra.mxu1 %v1309_v41 }
 0x3f9   :  { %v369_v0 = vpop.f32.mrf.mxu1 }
 0x3fa   :  { %1047 = vrsqrt.f32 %v369_v0  ;;  %v383_v1 = vadd.f32 1.0, %v369_v0  ;;  %vm378_vm13 = vweird.f32 %v369_v0 }
 0x3fc   :  { %1049 = vrcp.f32 %v383_v1  ;;  %v395_v25 = vand.u32 2147483648, %v383_v1  ;;  %v393_v34 = vand.u32 2147483647, %v383_v1  ;;  %vm389_vm15 = vweird.f32 %v383_v1 }
 0x3fe   :  { %v396_v11 = vor.u32 1.1754944e-38, %v395_v25  ;;  %vm394_vm2 = vcmp.eq.f32.partialorder %v393_v34, 8.507059e+37 }
 0x400   :  { %v1048_v2 = vpop.eup %1047 }
 0x401   :  { %v373_v3 = vmul.f32 %v1048_v2, %v369_v0  ;;  %vm379_vm11 = vweird.f32 %v1048_v2 }
 0x402   :  { %v1050_v4 = vpop.eup %1049  ;;  %vm380_vm14 = vmor %vm378_vm13, %vm379_vm11 }
 0x403   :  { %v374_v13 = vmul.f32 %v1048_v2, %v373_v3  ;;  %v385_v16 = vmul.f32 %v1050_v4, %v383_v1  ;;  %vm390_vm12 = vweird.f32 %v1050_v4 }
 0x404   :  { %vm391_vm1 = vmor %vm389_vm15, %vm390_vm12 }
 0x405   :  { %v375_v19 = vmul.f32 0.5, %v374_v13  ;;  %v386_v22 = vsub.f32 1.0, %v385_v16 }
 0x407   :  { %v376_v28 = vsub.f32 1.5, %v375_v19  ;;  %v387_v31 = vmul.f32 %v1050_v4, %v386_v22 }
 0x409   :  { %v377_v63 = vmul.f32 %v1048_v2, %v376_v28  ;;  %v388_v10 = vadd.f32 %v1050_v4, %v387_v31 }
 0x40b   :  { %v381_v12 = vsel %vm380_vm14, %v1048_v2, %v377_v63  ;;  %v392_v14 = vsel %vm391_vm1, %v1050_v4, %v388_v10 }
 0x40c   :  { %v382_v15 = vmul.f32 %v381_v12, %v369_v0  ;;  %v397_v17 = vsel %vm394_vm2, %v396_v11, %v392_v14 }
 0x40e   :  { %v398_v56 = vmul.f32 %v397_v17, %v382_v15 }
 0x410   :  { %1015 = vmatmul.msk.f32.vlgmr.msrb.gmra.mxu3 %vm116_vm8, %v398_v56 }
 0x411   :  { %874 = vmatpush.msrb.mxu3 %v1335_v43 }
 0x493   :  { %v419_v18 = vpop.f32.mrf.mxu3 }
 0x494   :  { %v426_v20 = vmul.f32 %v419_v18, %v338_v57  ;;  %v423_v24 = vrot.slane %v419_v18, 1 }
 0x496   :  { %v428_v21 = vperm.slane %v426_v20, 0  ;;  %v427_v26 = vmul.f32 %v423_v24, %v345_v58 }
 0x498   :  { %v430_v23 = vmul.f32 %v428_v21, %v1198_v5  ;;  %v431_v29 = vmul.f32 %v428_v21, %v1203_v6  ;;  %v429_v30 = vperm.slane %v427_v26, 0 }
 0x49a   :  { %450 = vmatmul.f32.vlgmr.msrb.gmra.mxu0 %v430_v23  ;;  %v432_v61 = vmul.f32 %v429_v30, %v1209_v7  ;;  %v433_v32 = vmul.f32 %v429_v30, %v1214_v8 }
 0x4a2   :  { %453 = vmatmul.f32.gmra.mxu0 %v431_v29 }
 0x4aa   :  { %456 = vmatmul.f32.gmra.mxu0 %v432_v61 }
 0x4b2   :  { %459 = vmatmul.f32.gmra.mxu0 %v433_v32 }
 0x517   :  { %v451_v35 = vpop.f32.mrf.mxu0 }
 0x518   :  { %v1452_v43 = vadd.f32 %v451_v35, %v1384_v27 }
 0x51a   :  { %v467_v36 = vsel %vm116_vm8, %v1452_v43, -inf }
 0x51b   :  { %468 = vmax.xlane.f32.xlu2 %v467_v36 }
 0x51f   :  { %v454_v39 = vpop.f32.mrf.mxu0 }
 0x520   :  { %v1457_v42 = vadd.f32 %v454_v39, %v1391_v33 }
 0x522   :  { %v470_v45 = vsel %vm116_vm8, %v1457_v42, -inf }
 0x523   :  { %471 = vmax.xlane.f32.xlu0 %v470_v45 }
 0x527   :  { %v457_v46 = vpop.f32.mrf.mxu0 }
 0x528   :  { %v1462_v47 = vadd.f32 %v457_v46, %v1395_v38 }
 0x52a   :  { %v473_v27 = vsel %vm116_vm8, %v1462_v47, -inf }
 0x52b   :  { %474 = vmax.xlane.f32.xlu1 %v473_v27 }
 0x52f   :  { %v460_v48 = vpop.f32.mrf.mxu0 }
 0x530   :  { %v1467_v49 = vadd.f32 %v460_v48, %v1399_v44 }
 0x532   :  { %v476_v33 = vsel %vm116_vm8, %v1467_v49, -inf }
 0x533   :  { %477 = vmax.xlane.f32.xlu2 %v476_v33 }
 0x58e   :  { %v469_v9 = vpop.xlane.xlu2 %468 }
 0x58f   :  { %v479_v50 = vsub.f32 %v1452_v43, %v469_v9 }
 0x591   :  { %v483_v52 = vmul.f32 1.442695, %v479_v50 }
 0x593   :  { %1051 = vpow2.f32 %v483_v52 }
 0x596   :  { %v472_v53 = vpop.xlane.xlu0 %471 }
 0x597   :  { %v480_v38 = vsub.f32 %v1457_v42, %v472_v53 }
 0x599   :  { %v1052_v54 = vpop.eup %1051  ;;  %v485_v51 = vmul.f32 1.442695, %v480_v38 }
 0x59a   :  { %v491_v55 = vsel %vm116_vm8, %v1052_v54, 0.0 }
 0x59b   :  { %1053 = vpow2.f32 %v485_v51  ;;  %492 = vadd.xlane.f32.xlu0 %v491_v55 }
 0x59e   :  { %v475_v44 = vpop.xlane.xlu1 %474 }
 0x59f   :  { %v481_v57 = vsub.f32 %v1462_v47, %v475_v44 }
 0x5a1   :  { %v1054_v58 = vpop.eup %1053  ;;  %v487_v59 = vmul.f32 1.442695, %v481_v57 }
 0x5a2   :  { %v494_v60 = vsel %vm116_vm8, %v1054_v58, 0.0 }
 0x5a3   :  { %1055 = vpow2.f32 %v487_v59  ;;  %495 = vadd.xlane.f32.xlu1 %v494_v60 }
 0x5a6   :  { %v478_v62 = vpop.xlane.xlu2 %477 }
 0x5a7   :  { %v482_v0 = vsub.f32 %v1467_v49, %v478_v62 }
 0x5a9   :  { %v1477_v1 = vpop.eup %1055  ;;  %v489_v2 = vmul.f32 1.442695, %v482_v0 }
 0x5aa   :  { %v497_v3 = vsel %vm116_vm8, %v1477_v1, 0.0 }
 0x5ab   :  { %1057 = vpow2.f32 %v489_v2  ;;  %498 = vadd.xlane.f32.xlu2 %v497_v3 }
 0x5b1   :  { %v1481_v4 = vpop.eup %1057 }
 0x5b2   :  { %v500_v13 = vsel %vm116_vm8, %v1481_v4, 0.0 }
 0x5b3   :  { %501 = vadd.xlane.f32.xlu0 %v500_v13 }
 0x60e   :  { %v493_v16 = vpop.xlane.xlu0 %492 }
 0x60f   :  { %1059 = vrcp.f32 %v493_v16  ;;  %v514_v31 = vand.u32 2147483648, %v493_v16  ;;  %v512_v63 = vand.u32 2147483647, %v493_v16  ;;  %vm508_vm4 = vweird.f32 %v493_v16 }
 0x611   :  { %v515_v12 = vor.u32 1.1754944e-38, %v514_v31  ;;  %vm513_vm6 = vcmp.eq.f32.partialorder %v512_v63, 8.507059e+37 }
 0x615   :  { %v1060_v19 = vpop.eup %1059 }
 0x616   :  { %v504_v22 = vmul.f32 %v1060_v19, %v493_v16  ;;  %v496_v25 = vpop.xlane.xlu1 %495  ;;  %vm509_vm3 = vweird.f32 %v1060_v19 }
 0x617   :  { %1061 = vrcp.f32 %v496_v25  ;;  %vm510_vm5 = vmor %vm508_vm4, %vm509_vm3  ;;  %v529_v21 = vand.u32 2147483648, %v496_v25  ;;  %v527_v24 = vand.u32 2147483647, %v496_v25  ;;  %vm523_vm9 = vweird.f32 %v496_v25 }
 0x618   :  { %v505_v28 = vsub.f32 1.0, %v504_v22 }
 0x619   :  { %v530_v30 = vor.u32 1.1754944e-38, %v529_v21  ;;  %vm528_vm11 = vcmp.eq.f32.partialorder %v527_v24, 8.507059e+37 }
 0x61a   :  { %v506_v34 = vmul.f32 %v1060_v19, %v505_v28 }
 0x61c   :  { %v507_v10 = vadd.f32 %v1060_v19, %v506_v34 }
 0x61d   :  { %v1062_v11 = vpop.eup %1061 }
 0x61e   :  { %v519_v14 = vmul.f32 %v1062_v11, %v496_v25  ;;  %v499_v15 = vpop.xlane.xlu2 %498  ;;  %v511_v17 = vsel %vm510_vm5, %v1060_v19, %v507_v10  ;;  %vm524_vm7 = vweird.f32 %v1062_v11 }
 0x61f   :  { %1063 = vrcp.f32 %v499_v15  ;;  %v516_v56 = vsel %vm513_vm6, %v515_v12, %v511_v17  ;;  %vm525_vm10 = vmor %vm523_vm9, %vm524_vm7  ;;  %v544_v46 = vand.u32 2147483648, %v499_v15  ;;  %v542_v48 = vand.u32 2147483647, %v499_v15 }
 0x620   :  { %v520_v18 = vsub.f32 1.0, %v519_v14  ;;  %v563_v20 = vmul.f32 %v1052_v54, %v516_v56  ;;  %vm538_vm13 = vweird.f32 %v499_v15 }
 0x621   :  { %v545_v50 = vor.u32 1.1754944e-38, %v544_v46  ;;  %vm543_vm15 = vcmp.eq.f32.partialorder %v542_v48, 8.507059e+37 }
 0x622   :  { %v521_v23 = vmul.f32 %v1062_v11, %v520_v18  ;;  %1016 = vmatmul.msk.f32.vlgmr.msrb.gmra.mxu1 %vm116_vm8, %v563_v20 }
 0x624   :  { %v522_v26 = vadd.f32 %v1062_v11, %v521_v23 }
 0x625   :  { %v1064_v29 = vpop.eup %1063 }
 0x626   :  { %v534_v61 = vmul.f32 %v1064_v29, %v499_v15  ;;  %v502_v32 = vpop.xlane.xlu0 %501  ;;  %v526_v35 = vsel %vm525_vm10, %v1062_v11, %v522_v26  ;;  %vm539_vm12 = vweird.f32 %v1064_v29 }
 0x627   :  { %1065 = vrcp.f32 %v502_v32  ;;  %v531_v36 = vsel %vm528_vm11, %v530_v30, %v526_v35  ;;  %vm540_vm14 = vmor %vm538_vm13, %vm539_vm12  ;;  %v559_v55 = vand.u32 2147483648, %v502_v32  ;;  %v557_v57 = vand.u32 2147483647, %v502_v32 }
 0x628   :  { %v535_v39 = vsub.f32 1.0, %v534_v61  ;;  %v564_v45 = vmul.f32 %v1054_v58, %v531_v36  ;;  %vm553_vm2 = vweird.f32 %v502_v32 }
 0x629   :  { %v560_v59 = vor.u32 1.1754944e-38, %v559_v55  ;;  %vm558_vm4 = vcmp.eq.f32.partialorder %v557_v57, 8.507059e+37  ;;  %v1094_v55 = vld [vmem:[%s1610_s3 + $0x60] sm:$0xff]  ;;  %v1096_v57 = vld [vmem:[%s1610_s3 + $0x50] sm:$0xff] }
 0x62a   :  { %v536_v27 = vmul.f32 %v1064_v29, %v535_v39  ;;  %1017 = vmatmul.msk.f32.gmra.mxu1 %vm116_vm8, %v564_v45 }
 0x62c   :  { %v537_v33 = vadd.f32 %v1064_v29, %v536_v27 }
 0x62d   :  { %v1066_v9 = vpop.eup %1065 }
 0x62e   :  { %v549_v52 = vmul.f32 %v1066_v9, %v502_v32  ;;  %v541_v53 = vsel %vm540_vm14, %v1064_v29, %v537_v33  ;;  %vm554_vm1 = vweird.f32 %v1066_v9 }
 0x62f   :  { %v546_v38 = vsel %vm543_vm15, %v545_v50, %v541_v53  ;;  %vm555_vm3 = vmor %vm553_vm2, %vm554_vm1 }
 0x630   :  { %v550_v54 = vsub.f32 1.0, %v549_v52  ;;  %v565_v51 = vmul.f32 %v1477_v1, %v546_v38  ;;  %v1091_v38 = vld [vmem:[%s1610_s3 + $0x78] sm:$0xff] }
 0x632   :  { %v551_v44 = vmul.f32 %v1066_v9, %v550_v54  ;;  %1018 = vmatmul.msk.f32.gmra.mxu1 %vm116_vm8, %v565_v51  ;;  %v1092_v54 = vld [vmem:[%s1610_s3 + $0x70] sm:$0xff]  ;;  %v1093_v51 = vld [vmem:[%s1610_s3 + $0x68] sm:$0xff] }
 0x634   :  { %v552_v58 = vadd.f32 %v1066_v9, %v551_v44  ;;  %v1095_v44 = vld [vmem:[%s1610_s3 + $0x58] sm:$0xff] }
 0x636   :  { %v556_v60 = vsel %vm555_vm3, %v1066_v9, %v552_v58  ;;  %v1097_v58 = vld [vmem:[%s1610_s3 + $0x48] sm:$0xff] }
 0x637   :  { %v561_v62 = vsel %vm558_vm4, %v560_v59, %v556_v60  ;;  %v1098_v59 = vld [vmem:[%s1610_s3 + $0x40] sm:$0xff]  ;;  %v1099_v60 = vld [vmem:[%s1610_s3 + $0x38] sm:$0xff] }
 0x638   :  { %v566_v0 = vmul.f32 %v1481_v4, %v561_v62  ;;  %v1100_v62 = vld [vmem:[%s1610_s3 + $0x30] sm:$0xff] }
 0x63a   :  { %1019 = vmatmul.msk.f32.gmra.mxu1 %vm116_vm8, %v566_v0  ;;  %v1101_v0 = vld [vmem:[%s1610_s3 + $0x28] sm:$0xff] }
 0x69f   :  { %v596_v2 = vpop.f32.mrf.mxu1 }
 0x6a0   :  { %v608_v13 = vmul.f32 %v596_v2, %v1198_v5  ;;  %v1102_v2 = vld [vmem:[%s1610_s3 + $0x20] sm:$0xff] }
 0x6a7   :  { %v599_v3 = vpop.f32.mrf.mxu1 }
 0x6a8   :  { %v609_v1 = vmul.f32 %v599_v3, %v1203_v6  ;;  %v1103_v3 = vld [vmem:[%s1610_s3 + $0x18] sm:$0xff] }
 0x6aa   :  { %v612_v16 = vadd.f32 %v609_v1, %v608_v13 }
 0x6ac   :  { %v613_v22 = vrot.slane %v612_v16, 4 }
 0x6ae   :  { %v614_v25 = vadd.f32 %v613_v22, %v612_v16 }
 0x6af   :  { %v602_v19 = vpop.f32.mrf.mxu1 }
 0x6b0   :  { %v615_v31 = vrot.slane %v614_v25, 2  ;;  %v610_v34 = vmul.f32 %v602_v19, %v1209_v7  ;;  %v1551_v19 = vld [vmem:[%s1611_s4] sm:$0xff] }
 0x6b2   :  { %v616_v4 = vadd.f32 %v615_v31, %v614_v25  ;;  %v1564_v31 = vld [vmem:[%s1611_s4 + $0x10] sm:$0xff] }
 0x6b4   :  { %v617_v14 = vrot.slane %v616_v4, 1 }
 0x6b6   :  { %v1495_v6 = vadd.f32 %v617_v14, %v616_v4 }
 0x6b7   :  { %v605_v28 = vpop.f32.mrf.mxu1 }
 0x6b8   :  { %v611_v63 = vmul.f32 %v605_v28, %v1214_v8  ;;  %v626_v18 = vmul.f32 %v1495_v6, %v1495_v6 }
 0x6ba   :  { %v619_v10 = vadd.f32 %v611_v63, %v610_v34  ;;  %v1570_v63 = vld [vmem:[%s1611_s4 + $0x18] sm:$0xff] }
 0x6bc   :  { %v620_v11 = vrot.slane %v619_v10, 4 }
 0x6be   :  { %v621_v12 = vadd.f32 %v620_v11, %v619_v10 }
 0x6c0   :  { %v622_v15 = vrot.slane %v621_v12, 2 }
 0x6c2   :  { %v623_v17 = vadd.f32 %v622_v15, %v621_v12 }
 0x6c4   :  { %v624_v5 = vrot.slane %v623_v17, 1 }
 0x6c6   :  { %v1497_v56 = vadd.f32 %v624_v5, %v623_v17 }
 0x6c8   :  { %v627_v7 = vmul.f32 %v1497_v56, %v1497_v56 }
 0x6ca   :  { %v630_v8 = vsel %vm66_vm0, %v627_v7, %v626_v18 }
 0x6cb   :  { %648 = vmatmul.f32.vlgmr.msra.gmra.mxu2 %v630_v8 }
 0x74e   :  { %v649_v20 = vpop.f32.mrf.mxu2 }
 0x74f   :  { %1067 = vrsqrt.f32 %v649_v20  ;;  %v663_v21 = vadd.f32 1.0, %v649_v20  ;;  %vm658_vm7 = vweird.f32 %v649_v20 }
 0x751   :  { %1069 = vrcp.f32 %v663_v21  ;;  %v675_v35 = vand.u32 2147483648, %v663_v21  ;;  %v673_v45 = vand.u32 2147483647, %v663_v21  ;;  %vm669_vm10 = vweird.f32 %v663_v21 }
 0x753   :  { %v676_v48 = vor.u32 1.1754944e-38, %v675_v35  ;;  %vm674_vm12 = vcmp.eq.f32.partialorder %v673_v45, 8.507059e+37 }
 0x755   :  { %v1068_v23 = vpop.eup %1067 }
 0x756   :  { %v653_v24 = vmul.f32 %v1068_v23, %v649_v20  ;;  %vm659_vm5 = vweird.f32 %v1068_v23 }
 0x757   :  { %v1070_v26 = vpop.eup %1069  ;;  %vm660_vm9 = vmor %vm658_vm7, %vm659_vm5 }
 0x758   :  { %v654_v29 = vmul.f32 %v1068_v23, %v653_v24  ;;  %v665_v30 = vmul.f32 %v1070_v26, %v663_v21  ;;  %vm670_vm6 = vweird.f32 %v1070_v26 }
 0x759   :  { %vm671_vm11 = vmor %vm669_vm10, %vm670_vm6 }
 0x75a   :  { %v655_v61 = vmul.f32 0.5, %v654_v29  ;;  %v666_v32 = vsub.f32 1.0, %v665_v30 }
 0x75c   :  { %v656_v36 = vsub.f32 1.5, %v655_v61  ;;  %v667_v39 = vmul.f32 %v1070_v26, %v666_v32 }
 0x75e   :  { %v657_v46 = vmul.f32 %v1068_v23, %v656_v36  ;;  %v668_v27 = vadd.f32 %v1070_v26, %v667_v39 }
 0x760   :  { %v661_v33 = vsel %vm660_vm9, %v1068_v23, %v657_v46  ;;  %v672_v9 = vsel %vm671_vm11, %v1070_v26, %v668_v27 }
 0x761   :  { %v662_v50 = vmul.f32 %v661_v33, %v649_v20  ;;  %v677_v52 = vsel %vm674_vm12, %v676_v48, %v672_v9 }
 0x763   :  { %v678_v53 = vmul.f32 %v677_v52, %v662_v50 }
 0x765   :  { %1020 = vmatmul.msk.f32.vlgmr.msra.gmra.mxu3 %vm116_vm8, %v678_v53 }
 0x766   :  { %912 = vmatpush.msra.mxu3 %v1091_v38 }
 0x768   :  { %913 = vmatpush.msra.mxu3 %v1092_v54 }
 0x76a   :  { %914 = vmatpush.msra.mxu3 %v1093_v51 }
 0x76c   :  { %915 = vmatpush.msra.mxu3 %v1094_v55 }
 0x76e   :  { %916 = vmatpush.msra.mxu3 %v1095_v44 }
 0x770   :  { %917 = vmatpush.msra.mxu3 %v1096_v57 }
 0x772   :  { %918 = vmatpush.msra.mxu3 %v1097_v58 }
 0x774   :  { %919 = vmatpush.msra.mxu3 %v1098_v59 }
 0x776   :  { %920 = vmatpush.msra.mxu3 %v1099_v60 }
 0x778   :  { %921 = vmatpush.msra.mxu3 %v1100_v62 }
 0x77a   :  { %922 = vmatpush.msra.mxu3 %v1101_v0 }
 0x77c   :  { %923 = vmatpush.msra.mxu3 %v1102_v2 }
 0x77e   :  { %924 = vmatpush.msra.mxu3 %v1103_v3 }
 0x780   :  { %925 = vmatpush.msra.mxu3 %v1291_v37  ;;  %v1558_v37 = vld [vmem:[%s1611_s4 + $0x8] sm:$0xff]  ;;  %s1134_s4 = smov [#allocation2]  }
 0x781   :  { %s999_s19 = sshll.u32 %s1134_s4, 4  ;;  %s1000_s19 = int_to_ptr.vmem [resolvable:$true] %s999_s19 }
 0x782   :  { %926 = vmatpush.msra.mxu3 %v1302_v40 }
 0x784   :  { %927 = vmatpush.msra.mxu3 %v1309_v41 }
 0x7e8   :  { %v699_v1 = vpop.f32.mrf.mxu3 }
 0x7e9   :  { %v706_v13 = vmul.f32 %v699_v1, %v1495_v6  ;;  %v703_v25 = vrot.slane %v699_v1, 1 }
 0x7eb   :  { %v708_v16 = vperm.slane %v706_v13, 0  ;;  %v707_v28 = vmul.f32 %v703_v25, %v1497_v56 }
 0x7ed   :  { %v710_v22 = vmul.f32 %v1551_v19, %v708_v16  ;;  %v711_v40 = vmul.f32 %v1558_v37, %v708_v16  ;;  %v709_v41 = vperm.slane %v707_v28, 0 }
 0x7ef   :  { %730 = vmatmul.f32.vlgmr.msra.gmra.mxu1 %v710_v22  ;;  %v712_v34 = vmul.f32 %v1564_v31, %v709_v41  ;;  %v713_v10 = vmul.f32 %v1570_v63, %v709_v41 }
 0x7f7   :  { %733 = vmatmul.f32.gmra.mxu1 %v711_v40 }
 0x7ff   :  { %736 = vmatmul.f32.gmra.mxu1 %v712_v34 }
 0x807   :  { %739 = vmatmul.f32.gmra.mxu1 %v713_v10 }
 0x86c   :  { %v731_v4 = vpop.f32.mrf.mxu1 }
 0x86d   :  { %v743_v11 = vadd.f32 %v731_v4, %v1452_v43 }
 0x86f   :  { %v747_v12 = vsel %vm116_vm8, %v743_v11, -inf }
 0x870   :  { %748 = vmax.xlane.f32.xlu1 %v747_v12 }
 0x874   :  { %v734_v14 = vpop.f32.mrf.mxu1 }
 0x875   :  { %v744_v15 = vadd.f32 %v734_v14, %v1457_v42 }
 0x877   :  { %v750_v17 = vsel %vm116_vm8, %v744_v15, -inf }
 0x878   :  { %751 = vmax.xlane.f32.xlu2 %v750_v17 }
 0x87c   :  { %v737_v6 = vpop.f32.mrf.mxu1 }
 0x87d   :  { %v745_v5 = vadd.f32 %v737_v6, %v1462_v47 }
 0x87f   :  { %v753_v56 = vsel %vm116_vm8, %v745_v5, -inf }
 0x880   :  { %754 = vmax.xlane.f32.xlu0 %v753_v56 }
 0x884   :  { %v740_v18 = vpop.f32.mrf.mxu1 }
 0x885   :  { %v746_v7 = vadd.f32 %v740_v18, %v1467_v49 }
 0x887   :  { %v756_v43 = vsel %vm116_vm8, %v746_v7, -inf }
 0x888   :  { %757 = vmax.xlane.f32.xlu1 %v756_v43 }
 0x8e3   :  { %v749_v8 = vpop.xlane.xlu1 %748 }
 0x8e4   :  { %v759_v20 = vsub.f32 %v743_v11, %v749_v8 }
 0x8e6   :  { %v763_v21 = vmul.f32 1.442695, %v759_v20 }
 0x8e8   :  { %1071 = vpow2.f32 %v763_v21 }
 0x8eb   :  { %v752_v42 = vpop.xlane.xlu2 %751 }
 0x8ec   :  { %v760_v23 = vsub.f32 %v744_v15, %v752_v42 }
 0x8ee   :  { %v1072_v24 = vpop.eup %1071  ;;  %v765_v26 = vmul.f32 1.442695, %v760_v23 }
 0x8ef   :  { %v771_v29 = vsel %vm116_vm8, %v1072_v24, 0.0 }
 0x8f0   :  { %1073 = vpow2.f32 %v765_v26  ;;  %772 = vadd.xlane.f32.xlu2 %v771_v29 }
 0x8f3   :  { %v755_v47 = vpop.xlane.xlu0 %754 }
 0x8f4   :  { %v761_v30 = vsub.f32 %v745_v5, %v755_v47 }
 0x8f6   :  { %v1074_v61 = vpop.eup %1073  ;;  %v767_v32 = vmul.f32 1.442695, %v761_v30 }
 0x8f7   :  { %v774_v49 = vsel %vm116_vm8, %v1074_v61, 0.0 }
 0x8f8   :  { %1075 = vpow2.f32 %v767_v32  ;;  %775 = vadd.xlane.f32.xlu0 %v774_v49 }
 0x8fb   :  { %v758_v35 = vpop.xlane.xlu1 %757 }
 0x8fc   :  { %v762_v36 = vsub.f32 %v746_v7, %v758_v35 }
 0x8fe   :  { %v1583_v39 = vpop.eup %1075  ;;  %v769_v45 = vmul.f32 1.442695, %v762_v36 }
 0x8ff   :  { %v777_v46 = vsel %vm116_vm8, %v1583_v39, 0.0 }
 0x900   :  { %1077 = vpow2.f32 %v769_v45  ;;  %778 = vadd.xlane.f32.xlu1 %v777_v46 }
 0x906   :  { %v1587_v27 = vpop.eup %1077 }
 0x907   :  { %v780_v48 = vsel %vm116_vm8, %v1587_v27, 0.0 }
 0x908   :  { %781 = vadd.xlane.f32.xlu2 %v780_v48 }
 0x963   :  { %v773_v33 = vpop.xlane.xlu2 %772 }
 0x964   :  { %1079 = vrcp.f32 %v773_v33  ;;  %v794_v38 = vand.u32 2147483648, %v773_v33  ;;  %v792_v51 = vand.u32 2147483647, %v773_v33  ;;  %vm788_vm14 = vweird.f32 %v773_v33 }
 0x966   :  { %v795_v57 = vor.u32 1.1754944e-38, %v794_v38  ;;  %vm793_vm1 = vcmp.eq.f32.partialorder %v792_v51, 8.507059e+37 }
 0x96a   :  { %v1080_v9 = vpop.eup %1079 }
 0x96b   :  { %v784_v50 = vmul.f32 %v1080_v9, %v773_v33  ;;  %v776_v52 = vpop.xlane.xlu0 %775  ;;  %vm789_vm13 = vweird.f32 %v1080_v9 }
 0x96c   :  { %1081 = vrcp.f32 %v776_v52  ;;  %vm790_vm15 = vmor %vm788_vm14, %vm789_vm13  ;;  %v809_v1 = vand.u32 2147483648, %v776_v52  ;;  %v807_v13 = vand.u32 2147483647, %v776_v52  ;;  %vm803_vm3 = vweird.f32 %v776_v52 }
 0x96d   :  { %v785_v53 = vsub.f32 1.0, %v784_v50 }
 0x96e   :  { %v810_v25 = vor.u32 1.1754944e-38, %v809_v1  ;;  %vm808_vm5 = vcmp.eq.f32.partialorder %v807_v13, 8.507059e+37 }
 0x96f   :  { %v786_v54 = vmul.f32 %v1080_v9, %v785_v53 }
 0x971   :  { %v787_v55 = vadd.f32 %v1080_v9, %v786_v54 }
 0x972   :  { %v1082_v44 = vpop.eup %1081 }
 0x973   :  { %v791_v58 = vsel %vm790_vm15, %v1080_v9, %v787_v55  ;;  %v799_v59 = vmul.f32 %v1082_v44, %v776_v52  ;;  %v779_v60 = vpop.xlane.xlu1 %778  ;;  %vm804_vm2 = vweird.f32 %v1082_v44 }
 0x974   :  { %v796_v62 = vsel %vm793_vm1, %v795_v57, %v791_v58  ;;  %1083 = vrcp.f32 %v779_v60  ;;  %vm805_vm4 = vmor %vm803_vm3, %vm804_vm2  ;;  %v824_v4 = vand.u32 2147483648, %v779_v60  ;;  %v822_v14 = vand.u32 2147483647, %v779_v60 }
 0x975   :  { %v800_v0 = vsub.f32 1.0, %v799_v59  ;;  %v843_v2 = vmul.f32 %v1072_v24, %v796_v62  ;;  %vm818_vm7 = vweird.f32 %v779_v60 }
 0x976   :  { %v825_v6 = vor.u32 1.1754944e-38, %v824_v4  ;;  %vm823_vm10 = vcmp.eq.f32.partialorder %v822_v14, 8.507059e+37 }
 0x977   :  { %v801_v3 = vmul.f32 %v1082_v44, %v800_v0  ;;  %1021 = vmatmul.msk.f32.vlgmr.msrb.gmra.mxu3 %vm116_vm8, %v843_v2 }
 0x979   :  { %v802_v16 = vadd.f32 %v1082_v44, %v801_v3 }
 0x97a   :  { %v1084_v22 = vpop.eup %1083 }
 0x97b   :  { %v814_v28 = vmul.f32 %v1084_v22, %v779_v60  ;;  %v782_v40 = vpop.xlane.xlu2 %781  ;;  %v806_v41 = vsel %vm805_vm4, %v1082_v44, %v802_v16  ;;  %vm819_vm6 = vweird.f32 %v1084_v22 }
 0x97c   :  { %1085 = vrcp.f32 %v782_v40  ;;  %v811_v10 = vsel %vm808_vm5, %v810_v25, %v806_v41  ;;  %vm820_vm9 = vmor %vm818_vm7, %vm819_vm6  ;;  %v839_v8 = vand.u32 2147483648, %v782_v40  ;;  %v837_v21 = vand.u32 2147483647, %v782_v40 }
 0x97d   :  { %v815_v34 = vsub.f32 1.0, %v814_v28  ;;  %v844_v11 = vmul.f32 %v1074_v61, %v811_v10  ;;  %vm833_vm12 = vweird.f32 %v782_v40 }
 0x97e   :  { %v840_v23 = vor.u32 1.1754944e-38, %v839_v8  ;;  %vm838_vm14 = vcmp.eq.f32.partialorder %v837_v21, 8.507059e+37 }
 0x97f   :  { %v816_v12 = vmul.f32 %v1084_v22, %v815_v34  ;;  %1022 = vmatmul.msk.f32.gmra.mxu3 %vm116_vm8, %v844_v11 }
 0x981   :  { %v817_v15 = vadd.f32 %v1084_v22, %v816_v12 }
 0x982   :  { %v1086_v17 = vpop.eup %1085 }
 0x983   :  { %v829_v5 = vmul.f32 %v1086_v17, %v782_v40  ;;  %v821_v56 = vsel %vm820_vm9, %v1084_v22, %v817_v15  ;;  %vm834_vm11 = vweird.f32 %v1086_v17 }
 0x984   :  { %v826_v18 = vsel %vm823_vm10, %v825_v6, %v821_v56  ;;  %vm835_vm13 = vmor %vm833_vm12, %vm834_vm11 }
 0x985   :  { %v830_v7 = vsub.f32 1.0, %v829_v5  ;;  %v845_v43 = vmul.f32 %v1583_v39, %v826_v18 }
 0x987   :  { %v831_v20 = vmul.f32 %v1086_v17, %v830_v7  ;;  %1023 = vmatmul.msk.f32.gmra.mxu3 %vm116_vm8, %v845_v43 }
 0x989   :  { %v832_v42 = vadd.f32 %v1086_v17, %v831_v20 }
 0x98b   :  { %v836_v24 = vsel %vm835_vm13, %v1086_v17, %v832_v42 }
 0x98c   :  { %v841_v26 = vsel %vm838_vm14, %v840_v23, %v836_v24 }
 0x98d   :  { %v846_v29 = vmul.f32 %v1587_v27, %v841_v26 }
 0x98f   :  { %1024 = vmatmul.msk.f32.gmra.mxu3 %vm116_vm8, %v846_v29 }
 0x9fa   :  { %v876_v47 = vpop.f32.mrf.mxu3 }
 0x9fb   :  { %v888_v32 = vmul.f32 %v1551_v19, %v876_v47 }
 0xa02   :  { %v879_v30 = vpop.f32.mrf.mxu3 }
 0xa03   :  { %v889_v61 = vmul.f32 %v1558_v37, %v879_v30 }
 0xa05   :  { %v892_v49 = vadd.f32 %v889_v61, %v888_v32 }
 0xa07   :  { %v893_v36 = vrot.slane %v892_v49, 4 }
 0xa09   :  { %v894_v39 = vadd.f32 %v893_v36, %v892_v49 }
 0xa0a   :  { %v882_v35 = vpop.f32.mrf.mxu3 }
 0xa0b   :  { %v895_v46 = vrot.slane %v894_v39, 2  ;;  %v890_v48 = vmul.f32 %v1564_v31, %v882_v35 }
 0xa0d   :  { %v896_v27 = vadd.f32 %v895_v46, %v894_v39 }
 0xa0f   :  { %v897_v53 = vrot.slane %v896_v27, 1 }
 0xa11   :  { %v898_v37 = vadd.f32 %v897_v53, %v896_v27 }
 0xa12   :  { %v885_v45 = vpop.f32.mrf.mxu3 }
 0xa13   :  { %v891_v33 = vmul.f32 %v1570_v63, %v885_v45  ;;  %v906_v55 = vmul.f32 %v898_v37, %v898_v37 }
 0xa15   :  { %v899_v9 = vadd.f32 %v891_v33, %v890_v48 }
 0xa17   :  { %v900_v50 = vrot.slane %v899_v9, 4 }
 0xa19   :  { %v901_v52 = vadd.f32 %v900_v50, %v899_v9 }
 0xa1b   :  { %v902_v38 = vrot.slane %v901_v52, 2 }
 0xa1d   :  { %v903_v54 = vadd.f32 %v902_v38, %v901_v52 }
 0xa1f   :  { %v904_v51 = vrot.slane %v903_v54, 1 }
 0xa21   :  { %v905_v19 = vadd.f32 %v904_v51, %v903_v54 }
 0xa23   :  { %v907_v44 = vmul.f32 %v905_v19, %v905_v19 }
 0xa25   :  { %v910_v57 = vsel %vm66_vm0, %v907_v44, %v906_v55 }
 0xa26   :  { %928 = vmatmul.f32.vlgmr.msra.gmra.mxu3 %v910_v57 }
 0xaa9   :  { %v929_v58 = vpop.f32.mrf.mxu3 }
 0xaaa   :  { %1087 = vrsqrt.f32 %v929_v58  ;;  %v943_v31 = vadd.f32 1.0, %v929_v58  ;;  %vm938_vm2 = vweird.f32 %v929_v58 }
 0xaac   :  { %1089 = vrcp.f32 %v943_v31  ;;  %v955_v1 = vand.u32 2147483648, %v943_v31  ;;  %v953_v22 = vand.u32 2147483647, %v943_v31  ;;  %vm949_vm4 = vweird.f32 %v943_v31 }
 0xaae   :  { %v956_v40 = vor.u32 1.1754944e-38, %v955_v1  ;;  %vm954_vm6 = vcmp.eq.f32.partialorder %v953_v22, 8.507059e+37 }
 0xab0   :  { %v1088_v63 = vpop.eup %1087 }
 0xab1   :  { %v933_v59 = vmul.f32 %v1088_v63, %v929_v58  ;;  %vm939_vm15 = vweird.f32 %v1088_v63 }
 0xab2   :  { %v1090_v60 = vpop.eup %1089  ;;  %vm940_vm3 = vmor %vm938_vm2, %vm939_vm15 }
 0xab3   :  { %v934_v62 = vmul.f32 %v1088_v63, %v933_v59  ;;  %v945_v0 = vmul.f32 %v1090_v60, %v943_v31  ;;  %vm950_vm1 = vweird.f32 %v1090_v60 }
 0xab4   :  { %vm951_vm5 = vmor %vm949_vm4, %vm950_vm1 }
 0xab5   :  { %v935_v2 = vmul.f32 0.5, %v934_v62  ;;  %v946_v3 = vsub.f32 1.0, %v945_v0 }
 0xab7   :  { %v936_v13 = vsub.f32 1.5, %v935_v2  ;;  %v947_v16 = vmul.f32 %v1090_v60, %v946_v3 }
 0xab9   :  { %v937_v25 = vmul.f32 %v1088_v63, %v936_v13  ;;  %v948_v28 = vadd.f32 %v1090_v60, %v947_v16 }
 0xabb   :  { %v941_v41 = vsel %vm940_vm3, %v1088_v63, %v937_v25  ;;  %v952_v34 = vsel %vm951_vm5, %v1090_v60, %v948_v28 }
 0xabc   :  { %v942_v10 = vmul.f32 %v941_v41, %v929_v58  ;;  %v957_v4 = vsel %vm954_vm6, %v956_v40, %v952_v34 }
 0xabe   :  { %v958_v11 = vmul.f32 %v957_v4, %v942_v10 }
 0xac0   :  { %1025 = vmatmul.msk.f32.vlgmr.msrb.gmra.mxu2 %vm116_vm8, %v958_v11 }
 0xb43   :  { %v979_v12 = vpop.f32.mrf.mxu2 }
 0xb44   :  { %v983_v14 = vrot.slane %v979_v12, 1  ;;  %v986_v17 = vmul.f32 %v979_v12, %v898_v37 }
 0xb46   :  { %v987_v15 = vmul.f32 %v983_v14, %v905_v19 }
 0xb48   :  { %v990_v6 = vrot.slane %v987_v15, 7 }
 0xb4a   :  { %v991_v5 = vsel %vm66_vm0, %v990_v6, %v986_v17 }
 0xb4b   :  { %993 = vst [vmem:[#allocation2] sm:$0x3] %v991_v5 }
 0xb4c   :  { %1004 = dma.vmem_to_hbm [thread:$0]  %s1000_s19, 32, %s1002_s22, [#allocation3]  }
 0xb4d   :  { %1132 = dma.done.wait [#allocation3], 32  }
 0xb4e   :  { %1133 = vsyncadd [#allocation3], 4294967264 }
 0xb4f   :  { %1009 = vsyncpa [#allocation3], 1 }

</bundles_post_ra>
